<compile_context>
chip_gen: v7x
topology: tpu7x:2x2x1
jax: 0.10.0
libtpu: 0.0.40
codegen_flags: <defaults>
</compile_context>

<pallas_src>
import functools

import jax
import jax.numpy as jnp
from jax.experimental import pallas as pl
from jax.experimental.pallas import tpu as pltpu


# ----------------------------- helpers -------------------------------------

def _round_up(x, m):
    return (x + m - 1) // m * m


def _cdiv(a, b):
    return -(-a // b)


@functools.lru_cache(maxsize=None)
def _vmem_capacity_bytes():
    """Per-core VMEM capacity; conservative 64 MiB fallback (v7x-sized)."""
    try:
        fn = getattr(pltpu, "get_tpu_info", None)
        if fn is not None:
            info = fn()
            for name in ("vmem_capacity_bytes", "vmem_bytes", "vmem_size_bytes"):
                v = getattr(info, name, None)
                if v:
                    return int(v)
    except Exception:
        pass
    return 64 * 1024 * 1024


def _pick_tiles(m, k_pad, c_pad, in_bytes, out_bytes, vmem_budget):
    """Choose (tm, tk): keep tm large (<=512, mult of 8, >=2 M-steps when
    possible) and shrink tk (divisor of k_pad, mult of 128) first to fit VMEM."""
    q = k_pad // 128
    tk_cands = sorted({128 * d for d in range(1, q + 1)
                       if q % d == 0 and 128 * d <= 4096}, reverse=True)

    def fits(tm, tk):
        need = (2 * tm * tk * in_bytes          # double-buffered patch block
                + 2 * tk * c_pad * in_bytes     # double-buffered weight block
                + 2 * tm * c_pad * out_bytes    # double-buffered output block
                + tm * c_pad * 4                # f32 accumulator scratch
                + 2 * c_pad * 4)                # bias
        return need <= vmem_budget

    tm = min(512, _round_up(m, 8))
    if m > 8 and _cdiv(m, tm) < 2:
        # >= 2 grid steps along M so v7x's two TensorCores both get work.
        tm = max(8, _round_up(_cdiv(m, 2), 8))

    while True:
        for tk in tk_cands:
            if fits(tm, tk):
                return tm, tk
        if tm <= 8:
            return 8, 128
        tm = max(8, _round_up(tm // 2, 8))


# ----------------------------- Pallas kernel --------------------------------

def _make_matmul_kernel(apply_relu):
    def kernel(p_ref, w_ref, b_ref, o_ref, acc_ref):
        @pl.when(pl.program_id(1) == 0)
        def _():
            acc_ref[...] = jnp.zeros_like(acc_ref)

        acc_ref[...] += jnp.dot(p_ref[...], w_ref[...],
                                preferred_element_type=jnp.float32)

        @pl.when(pl.program_id(1) == pl.num_programs(1) - 1)
        def _():
            acc = acc_ref[...] + b_ref[...]          # exact f32 bias add
            if apply_relu:
                acc = jnp.maximum(acc, 0.0)
            o_ref[...] = acc.astype(o_ref.dtype)
    return kernel


# ------------------------------- JAX glue -----------------------------------

def _im2col_cols(x, kh, kw, stride, pad):
    """x: (N,H,W,C) -> list of kh*kw strided views (N,Ho,Wo,C), tap order (kh,kw)."""
    N, H, W, C = x.shape
    xp = jnp.pad(x, ((0, 0), (pad, pad), (pad, pad), (0, 0)))
    Ho = (H + 2 * pad - kh) // stride + 1
    Wo = (W + 2 * pad - kw) // stride + 1
    cols = []
    for i in range(kh):
        for j in range(kw):
            cols.append(xp[:, i:i + stride * (Ho - 1) + 1:stride,
                              j:j + stride * (Wo - 1) + 1:stride, :])
    return cols, (N, Ho, Wo)


def _w_to_matrix(w):
    """Torch OIHW (Cout,Cin,KH,KW) -> (KH*KW*Cin, Cout); rows ordered (kh,kw,cin)."""
    cout, cin, kh, kw = w.shape
    return jnp.transpose(w, (2, 3, 1, 0)).reshape(kh * kw * cin, cout)


def _pack_patches(cols, k_pad, dtype):
    """Single concatenate producing (M, k_pad) directly (zero K-padding)."""
    n, ho, wo, _ = cols[0].shape
    k = sum(c.shape[-1] for c in cols)
    parts = [c.astype(dtype) for c in cols]
    if k_pad > k:
        parts.append(jnp.zeros((n, ho, wo, k_pad - k), dtype))
    p = jnp.concatenate(parts, axis=-1)
    return p.reshape(n * ho * wo, k_pad)


def _pack_weights(w_mats, k_pad, c_pad, dtype):
    w = w_mats[0] if len(w_mats) == 1 else jnp.concatenate(w_mats, axis=0)
    k, cout = w.shape
    return jnp.pad(w, ((0, k_pad - k), (0, c_pad - cout))).astype(dtype)


def _pack_bias(bias, c_pad):
    b = bias.astype(jnp.float32)
    return jnp.pad(b, (0, c_pad - b.shape[0]))[None, :]


def _conv_matmul(cols, w_mats, bias, out_dtype, apply_relu, compute_dtype):
    n, ho, wo, _ = cols[0].shape
    m = n * ho * wo
    k = sum(c.shape[-1] for c in cols)
    cout = bias.shape[0]
    k_pad = _round_up(k, 128)
    c_pad = _round_up(cout, 128)

    in_b = jnp.dtype(compute_dtype).itemsize
    out_b = jnp.dtype(out_dtype).itemsize
    vmem_cap = _vmem_capacity_bytes()
    budget = max(8 * 1024 * 1024, int(vmem_cap * 0.35))
    vmem_limit = int(min(vmem_cap - 16 * 1024 * 1024,
                         max(budget + 16 * 1024 * 1024, int(vmem_cap * 0.6))))

    tm, tk = _pick_tiles(m, k_pad, c_pad, in_b, out_b, budget)
    gm, gk = _cdiv(m, tm), k_pad // tk

    p = _pack_patches(cols, k_pad, compute_dtype)
    w = _pack_weights(w_mats, k_pad, c_pad, compute_dtype)
    b = _pack_bias(bias, c_pad)

    out = pl.pallas_call(
        _make_matmul_kernel(apply_relu),
        out_shape=jax.ShapeDtypeStruct((m, c_pad), out_dtype),
        grid=(gm, gk),
        in_specs=[pl.BlockSpec((tm, tk), lambda i, kk: (i, kk)),
                  pl.BlockSpec((tk, c_pad), lambda i, kk: (kk, 0)),
                  pl.BlockSpec((1, c_pad), lambda i, kk: (0, 0))],
        out_specs=pl.BlockSpec((tm, c_pad), lambda i, kk: (i, 0)),
        scratch_shapes=[pltpu.VMEM((tm, c_pad), jnp.float32)],
        compiler_params=pltpu.CompilerParams(
            dimension_semantics=("parallel", "arbitrary"),
            vmem_limit_bytes=vmem_limit),
    )(p, w, b)
    return out[:, :cout]


def init_params(key, c_in, c_out):
    ks = jax.random.split(key, 6)
    s1 = 1.0 / (c_in * 81) ** 0.5
    s2 = 1.0 / (c_in * 9) ** 0.5
    return dict(
        w1=jax.random.uniform(ks[0], (c_in, c_in, 9, 9), jnp.float32, -s1, s1),
        b1=jax.random.uniform(ks[1], (c_in,), jnp.float32, -s1, s1),
        w2=jax.random.uniform(ks[2], (c_out, c_in, 3, 3), jnp.float32, -s2, s2),
        b2=jax.random.uniform(ks[3], (c_out,), jnp.float32, -s2, s2),
        wc=jax.random.uniform(ks[4], (c_out, c_in, 3, 3), jnp.float32, -s2, s2),
        bc=jax.random.uniform(ks[5], (c_out,), jnp.float32, -s2, s2),
    )


@functools.partial(jax.jit, static_argnames=("compute_dtype",))
def residual_block2_forward(x, params, compute_dtype=jnp.bfloat16):
    N, Cin, H, W = x.shape
    Cout = params['w2'].shape[0]
    # Cast to compute dtype BEFORE im2col: halves the HBM bytes of the whole
    # XLA-level patch pipeline.
    x_nhwc = jnp.transpose(x.astype(compute_dtype), (0, 2, 3, 1))

    # --- conv_block conv1: Conv2d(Cin, Cin, 9, stride=4, pad=4) + ReLU ---
    cols9, (n, ho, wo) = _im2col_cols(x_nhwc, 9, 9, stride=4, pad=4)
    y1 = _conv_matmul(cols9, [_w_to_matrix(params['w1'])], params['b1'],
                      out_dtype=compute_dtype, apply_relu=True,
                      compute_dtype=compute_dtype)
    y1 = y1.reshape(n, ho, wo, Cin)                  # NHWC, no transpose

    # --- conv_block conv2 (3x3 s1 p1) + skip conv (3x3 s4 p1): merged matmul ---
    cols3, sp3 = _im2col_cols(y1, 3, 3, stride=1, pad=1)
    colss, sps = _im2col_cols(x_nhwc, 3, 3, stride=4, pad=1)
    assert sp3 == sps == (n, ho, wo), (sp3, sps, (n, ho, wo))
    out = _conv_matmul(cols3 + colss,
                       [_w_to_matrix(params['w2']), _w_to_matrix(params['wc'])],
                       params['b2'] + params['bc'],
                       out_dtype=x.dtype, apply_relu=False,
                       compute_dtype=compute_dtype)
    out = out.reshape(n, ho, wo, Cout)
    return jnp.transpose(out, (0, 3, 1, 2))          # back to NCHW


# ------------------------------- reference ----------------------------------

def _conv2d_ref(x, w, b, stride, pad):
    y = jax.lax.conv_general_dilated(
        x, w, (stride, stride), ((pad, pad), (pad, pad)),
        dimension_numbers=('NCHW', 'OIHW', 'NCHW'))
    return y + b[None, :, None, None]


def residual_block2_ref(x, p):
    branch = _conv2d_ref(x, p['w1'], p['b1'], 4, 4)
    branch = jnp.maximum(branch, 0.0)
    branch = _conv2d_ref(branch, p['w2'], p['b2'], 1, 1)
    skip = _conv2d_ref(x, p['wc'], p['bc'], 4, 1)
    return skip + branch


# --------------------------------- main --------------------------------------

if __name__ == "__main__":
    key = jax.random.PRNGKey(0)
    kx, kp = jax.random.split(key)

    N, Cin, Cout, H, W = 2, 4, 8, 16, 16
    x = jax.random.normal(kx, (N, Cin, H, W), jnp.float32)
    params = init_params(kp, Cin, Cout)

    ref = jax.block_until_ready(residual_block2_ref(x, params))

    # f32 path: tight structural-correctness check.
    out_f32 = jax.block_until_ready(
        residual_block2_forward(x, params, compute_dtype=jnp.float32))
    assert out_f32.shape == ref.shape == (N, Cout, 4, 4), (out_f32.shape, ref.shape)
    assert jnp.allclose(out_f32, ref, atol=1e-4, rtol=1e-4), \
        float(jnp.max(jnp.abs(out_f32 - ref)))

    # bf16 path (default, MXU-optimal): tolerance sized for bf16 inputs with
    # f32 accumulation and exact f32 bias.
    out = jax.block_until_ready(residual_block2_forward(x, params))
    assert out.shape == ref.shape
    assert jnp.allclose(out, ref, atol=5e-2, rtol=5e-2), \
        float(jnp.max(jnp.abs(out - ref)))

    print("KERNEL_OK")
</pallas_src>

<mosaic_0001>
module attributes {stable_mosaic.version = 11 : i64} {
  func.func @kernel(%arg0: i32, %arg1: i32, %arg2: memref<16x384xf32, #tpu.memory_space<vmem>>, %arg3: memref<384x128xf32, #tpu.memory_space<vmem>>, %arg4: memref<1x128xf32, #tpu.memory_space<vmem>>, %arg5: memref<16x128xf32, #tpu.memory_space<vmem>>, %arg6: memref<16x128xf32, #tpu.memory_space<vmem>>) attributes {dimension_semantics = [#tpu.dimension_semantics<parallel>, #tpu.dimension_semantics<arbitrary>], iteration_bounds = array<i64: 2, 1>, scalar_prefetch = 0 : i64, scratch_operands = 1 : i64, tpu.core_type = #tpu.core_type<tc>, window_params = [{transform_indices = @transform_0, window_bounds = array<i64: 16, 384>}, {transform_indices = @transform_1, window_bounds = array<i64: 384, 128>}, {pipeline_mode = #tpu.pipeline_mode<synchronous>, transform_indices = @transform_2, window_bounds = array<i64: 1, 128>}, {transform_indices = @transform_3, window_bounds = array<i64: 16, 128>}]} {
    %c0_i32 = arith.constant 0 : i32
    %0 = arith.cmpi eq, %arg1, %c0_i32 : i32
    %1 = arith.extui %0 : i1 to i32
    %c0_i32_0 = arith.constant 0 : i32
    %2 = arith.cmpi ne, %1, %c0_i32_0 : i32
    scf.if %2 {
      %cst_10 = arith.constant 0.000000e+00 : f32
      %12 = vector.broadcast %cst_10 : f32 to vector<16x128xf32>
      %c0_11 = arith.constant 0 : index
      %c0_12 = arith.constant 0 : index
      %13 = vector.load %arg6[%c0_11, %c0_12] : memref<16x128xf32, #tpu.memory_space<vmem>>, vector<16x128xf32>
      tpu.vector_store %arg6[%c0_11, %c0_12], %12 {strides = array<i32>} : memref<16x128xf32, #tpu.memory_space<vmem>>, vector<16x128xf32>,
    } else {
    }
    %c0 = arith.constant 0 : index
    %c0_1 = arith.constant 0 : index
    %3 = vector.load %arg6[%c0, %c0_1] : memref<16x128xf32, #tpu.memory_space<vmem>>, vector<16x128xf32>
    %c0_2 = arith.constant 0 : index
    %c0_3 = arith.constant 0 : index
    %4 = vector.load %arg2[%c0_2, %c0_3] : memref<16x384xf32, #tpu.memory_space<vmem>>, vector<16x384xf32>
    %c0_4 = arith.constant 0 : index
    %c0_5 = arith.constant 0 : index
    %5 = vector.load %arg3[%c0_4, %c0_5] : memref<384x128xf32, #tpu.memory_space<vmem>>, vector<384x128xf32>
    %cst = arith.constant dense<0.000000e+00> : vector<16x128xf32>
    %6 = tpu.matmul %4, %5, %cst {dimension_numbers = #tpu.dot_dimension_numbers<[1], [0], [0], [1], [0, 0, 1, 1], [], []>} : vector<16x384xf32>, vector<384x128xf32>, vector<16x128xf32> -> vector<16x128xf32>
    %7 = arith.addf %3, %6 : vector<16x128xf32>
    %c0_6 = arith.constant 0 : index
    %c0_7 = arith.constant 0 : index
    %8 = vector.load %arg6[%c0_6, %c0_7] : memref<16x128xf32, #tpu.memory_space<vmem>>, vector<16x128xf32>
    tpu.vector_store %arg6[%c0_6, %c0_7], %7 {strides = array<i32>} : memref<16x128xf32, #tpu.memory_space<vmem>>, vector<16x128xf32>,
    %c0_i32_8 = arith.constant 0 : i32
    %9 = arith.cmpi eq, %arg1, %c0_i32_8 : i32
    %10 = arith.extui %9 : i1 to i32
    %c0_i32_9 = arith.constant 0 : i32
    %11 = arith.cmpi ne, %10, %c0_i32_9 : i32
    scf.if %11 {
      %c0_10 = arith.constant 0 : index
      %c0_11 = arith.constant 0 : index
      %12 = vector.load %arg6[%c0_10, %c0_11] : memref<16x128xf32, #tpu.memory_space<vmem>>, vector<16x128xf32>
      %c0_12 = arith.constant 0 : index
      %c0_13 = arith.constant 0 : index
      %13 = vector.load %arg4[%c0_12, %c0_13] : memref<1x128xf32, #tpu.memory_space<vmem>>, vector<1x128xf32>
      %14 = vector.broadcast %13 : vector<1x128xf32> to vector<16x128xf32>
      %15 = arith.addf %12, %14 : vector<16x128xf32>
      %cst_14 = arith.constant 0.000000e+00 : f32
      %16 = vector.broadcast %cst_14 : f32 to vector<16x128xf32>
      %17 = arith.maximumf %15, %16 : vector<16x128xf32>
      %c0_15 = arith.constant 0 : index
      %c0_16 = arith.constant 0 : index
      %18 = vector.load %arg5[%c0_15, %c0_16] : memref<16x128xf32, #tpu.memory_space<vmem>>, vector<16x128xf32>
      tpu.vector_store %arg5[%c0_15, %c0_16], %17 {strides = array<i32>} : memref<16x128xf32, #tpu.memory_space<vmem>>, vector<16x128xf32>,
    } else {
    }
    return
  }
  func.func @transform_0(%arg0: i32, %arg1: i32) -> (i32, i32) {
    %c0_i32 = arith.constant 0 : i32
    return %arg0, %arg1 : i32, i32
  }
  func.func @transform_1(%arg0: i32, %arg1: i32) -> (i32, i32) {
    %c0_i32 = arith.constant 0 : i32
    %c0_i32_0 = arith.constant 0 : i32
    return %arg1, %c0_i32 : i32, i32
  }
  func.func @transform_2(%arg0: i32, %arg1: i32) -> (i32, i32) {
    %c0_i32 = arith.constant 0 : i32
    %c0_i32_0 = arith.constant 0 : i32
    %c0_i32_1 = arith.constant 0 : i32
    return %c0_i32, %c0_i32_0 : i32, i32
  }
  func.func @transform_3(%arg0: i32, %arg1: i32) -> (i32, i32) {
    %c0_i32 = arith.constant 0 : i32
    %c0_i32_0 = arith.constant 0 : i32
    return %arg0, %c0_i32 : i32, i32
  }
}

module attributes {stable_mosaic.version = 11 : i64} {
  func.func @kernel(%arg0: i32, %arg1: i32, %arg2: memref<16x128xf32, #tpu.memory_space<vmem>>, %arg3: memref<128x128xf32, #tpu.memory_space<vmem>>, %arg4: memref<1x128xf32, #tpu.memory_space<vmem>>, %arg5: memref<16x128xf32, #tpu.memory_space<vmem>>, %arg6: memref<16x128xf32, #tpu.memory_space<vmem>>) attributes {dimension_semantics = [#tpu.dimension_semantics<parallel>, #tpu.dimension_semantics<arbitrary>], iteration_bounds = array<i64: 2, 1>, scalar_prefetch = 0 : i64, scratch_operands = 1 : i64, tpu.core_type = #tpu.core_type<tc>, window_params = [{transform_indices = @transform_0, window_bounds = array<i64: 16, 128>}, {transform_indices = @transform_1, window_bounds = array<i64: 128, 128>}, {pipeline_mode = #tpu.pipeline_mode<synchronous>, transform_indices = @transform_2, window_bounds = array<i64: 1, 128>}, {transform_indices = @transform_3, window_bounds = array<i64: 16, 128>}]} {
    %c0_i32 = arith.constant 0 : i32
    %0 = arith.cmpi eq, %arg1, %c0_i32 : i32
    %1 = arith.extui %0 : i1 to i32
    %c0_i32_0 = arith.constant 0 : i32
    %2 = arith.cmpi ne, %1, %c0_i32_0 : i32
    scf.if %2 {
      %cst_10 = arith.constant 0.000000e+00 : f32
      %12 = vector.broadcast %cst_10 : f32 to vector<16x128xf32>
      %c0_11 = arith.constant 0 : index
      %c0_12 = arith.constant 0 : index
      %13 = vector.load %arg6[%c0_11, %c0_12] : memref<16x128xf32, #tpu.memory_space<vmem>>, vector<16x128xf32>
      tpu.vector_store %arg6[%c0_11, %c0_12], %12 {strides = array<i32>} : memref<16x128xf32, #tpu.memory_space<vmem>>, vector<16x128xf32>,
    } else {
    }
    %c0 = arith.constant 0 : index
    %c0_1 = arith.constant 0 : index
    %3 = vector.load %arg6[%c0, %c0_1] : memref<16x128xf32, #tpu.memory_space<vmem>>, vector<16x128xf32>
    %c0_2 = arith.constant 0 : index
    %c0_3 = arith.constant 0 : index
    %4 = vector.load %arg2[%c0_2, %c0_3] : memref<16x128xf32, #tpu.memory_space<vmem>>, vector<16x128xf32>
    %c0_4 = arith.constant 0 : index
    %c0_5 = arith.constant 0 : index
    %5 = vector.load %arg3[%c0_4, %c0_5] : memref<128x128xf32, #tpu.memory_space<vmem>>, vector<128x128xf32>
    %cst = arith.constant dense<0.000000e+00> : vector<16x128xf32>
    %6 = tpu.matmul %4, %5, %cst {dimension_numbers = #tpu.dot_dimension_numbers<[1], [0], [0], [1], [0, 0, 1, 1], [], []>} : vector<16x128xf32>, vector<128x128xf32>, vector<16x128xf32> -> vector<16x128xf32>
    %7 = arith.addf %3, %6 : vector<16x128xf32>
    %c0_6 = arith.constant 0 : index
    %c0_7 = arith.constant 0 : index
    %8 = vector.load %arg6[%c0_6, %c0_7] : memref<16x128xf32, #tpu.memory_space<vmem>>, vector<16x128xf32>
    tpu.vector_store %arg6[%c0_6, %c0_7], %7 {strides = array<i32>} : memref<16x128xf32, #tpu.memory_space<vmem>>, vector<16x128xf32>,
    %c0_i32_8 = arith.constant 0 : i32
    %9 = arith.cmpi eq, %arg1, %c0_i32_8 : i32
    %10 = arith.extui %9 : i1 to i32
    %c0_i32_9 = arith.constant 0 : i32
    %11 = arith.cmpi ne, %10, %c0_i32_9 : i32
    scf.if %11 {
      %c0_10 = arith.constant 0 : index
      %c0_11 = arith.constant 0 : index
      %12 = vector.load %arg6[%c0_10, %c0_11] : memref<16x128xf32, #tpu.memory_space<vmem>>, vector<16x128xf32>
      %c0_12 = arith.constant 0 : index
      %c0_13 = arith.constant 0 : index
      %13 = vector.load %arg4[%c0_12, %c0_13] : memref<1x128xf32, #tpu.memory_space<vmem>>, vector<1x128xf32>
      %14 = vector.broadcast %13 : vector<1x128xf32> to vector<16x128xf32>
      %15 = arith.addf %12, %14 : vector<16x128xf32>
      %c0_14 = arith.constant 0 : index
      %c0_15 = arith.constant 0 : index
      %16 = vector.load %arg5[%c0_14, %c0_15] : memref<16x128xf32, #tpu.memory_space<vmem>>, vector<16x128xf32>
      tpu.vector_store %arg5[%c0_14, %c0_15], %15 {strides = array<i32>} : memref<16x128xf32, #tpu.memory_space<vmem>>, vector<16x128xf32>,
    } else {
    }
    return
  }
  func.func @transform_0(%arg0: i32, %arg1: i32) -> (i32, i32) {
    %c0_i32 = arith.constant 0 : i32
    return %arg0, %arg1 : i32, i32
  }
  func.func @transform_1(%arg0: i32, %arg1: i32) -> (i32, i32) {
    %c0_i32 = arith.constant 0 : i32
    %c0_i32_0 = arith.constant 0 : i32
    return %arg1, %c0_i32 : i32, i32
  }
  func.func @transform_2(%arg0: i32, %arg1: i32) -> (i32, i32) {
    %c0_i32 = arith.constant 0 : i32
    %c0_i32_0 = arith.constant 0 : i32
    %c0_i32_1 = arith.constant 0 : i32
    return %c0_i32, %c0_i32_0 : i32, i32
  }
  func.func @transform_3(%arg0: i32, %arg1: i32) -> (i32, i32) {
    %c0_i32 = arith.constant 0 : i32
    %c0_i32_0 = arith.constant 0 : i32
    return %arg0, %c0_i32 : i32, i32
  }
}

</mosaic_0001>

<bundles_post_ra>
// kernel: residual_block2_forward.2
= control target key start
LH: loop header
LB: loop body
LE: loop exit
PB: predicated region body
PF: predicated region fallthrough
CT: control target
= control target key end

     0   :  { %s784_s12 = smov 0   ;;  %s786_s13 = smov 0   ;;  %s985_s0 = inlined_call_operand.vmem [shape: f32[32,384], index: 0, kind: input, shape index: {}]   ;;  %s986_s1 = inlined_call_operand.vmem [shape: f32[384,128], index: 1, kind: input, shape index: {}]   ;;  %s987_s2 = inlined_call_operand.vmem [shape: f32[1,128], index: 2, kind: input, shape index: {}]   ;;  %s988_s3 = inlined_call_operand.vmem [shape: f32[32,128], index: 3, kind: output, shape index: {}]  }
   0x1   :  { %s788_s14 = smov 0  }
   0x2 LB: > { %s25_s15 = sadd.s32 1, %s758_s13  ;;  %p552_p0 = scmp.ge.s32.totalorder %s762_s14, 1  ;;  %s762_s14 = sphi %s788_s14, %s13_s14   ;;  %s758_s13 = sphi %s786_s13, %s991_s13   ;;  %s754_s12 = sphi %s784_s12, %s990_s12  }
   0x3   : > { %p27_p1 = scmp.ge.s32.totalorder %s25_s15, 2  ;;  %p169_p2 = scmp.lt.s32.totalorder %s762_s14, 3 }
   0x5   : > { %s993_s15 = smov (%p27_p1, %s25_s15), 0  ;;  %p170_p3 = pnand %p552_p0, %p169_p2 }
   0x6   : > { %v257_v0 = vld [vmem:[%s986_s1 + $0x80] sm:$0xff] (!%p170_p3)  ;;  %v258_v1 = vld [vmem:[%s986_s1 + $0x88] sm:$0xff] (!%p170_p3)  ;;  %s553_s22 = sshll.u32 (!%p170_p3), %s754_s12, 1  ;;  %v259_v9 = vld [vmem:[%s986_s1 + $0x90] sm:$0xff] (!%p170_p3) }
   0x7   : > { %173 = sbr.rel (%p170_p3) target bundleno = 267 (0x10b), region = 32  ;;  %v241_v2 = vld [vmem:[%s986_s1] sm:$0xff] (!%p170_p3)  ;;  %v651_v3 = vpack.c.bf16 (!%p170_p3), %v258_v1, %v257_v0  ;;  %v242_v4 = vld [vmem:[%s986_s1 + $0x8] sm:$0xff] (!%p170_p3)  ;;  %p823_p4 = scmp.lt.s32.totalorder (!%p170_p3), %s553_s22, 3  ;;  %v260_v10 = vld [vmem:[%s986_s1 + $0x98] sm:$0xff] (!%p170_p3) }
   0x8   : > { %v273_v5 = vld [vmem:[%s986_s1 + $0x100] sm:$0xff] (!%p170_p3)  ;;  %v274_v6 = vld [vmem:[%s986_s1 + $0x108] sm:$0xff] (!%p170_p3)  ;;  %v653_v7 = vpack.c.bf16 (!%p170_p3), %v242_v4, %v241_v2  ;;  %v243_v11 = vld [vmem:[%s986_s1 + $0x10] sm:$0xff] (!%p170_p3)  ;;  %v655_v12 = vpack.c.bf16 (!%p170_p3), %v260_v10, %v259_v9 }
   0x9   : > { %v683_v8 = vpack.c.bf16 (!%p170_p3), %v274_v6, %v273_v5  ;;  %652 = vmatprep.subr.bf16.mxu0 (!%p170_p3), %v651_v3  ;;  %v244_v13 = vld [vmem:[%s986_s1 + $0x18] sm:$0xff] (!%p170_p3)  ;;  %v275_v14 = vld [vmem:[%s986_s1 + $0x110] sm:$0xff] (!%p170_p3)  ;;  %v261_v18 = vld [vmem:[%s986_s1 + $0xa0] sm:$0xff] (!%p170_p3) }
   0xa   : > { %v276_v15 = vld [vmem:[%s986_s1 + $0x118] sm:$0xff] (!%p170_p3)  ;;  %654 = vmatpush3.bf16.msra.mxu0 (!%p170_p3), %v653_v7  ;;  %v657_v16 = vpack.c.bf16 (!%p170_p3), %v244_v13, %v243_v11  ;;  %v262_v19 = vld [vmem:[%s986_s1 + $0xa8] sm:$0xff] (!%p170_p3)  ;;  %v245_v20 = vld [vmem:[%s986_s1 + $0x20] sm:$0xff] (!%p170_p3) }
   0xb   : > { %684 = vmatprep.subr.bf16.mxu1 (!%p170_p3), %v683_v8  ;;  %v687_v17 = vpack.c.bf16 (!%p170_p3), %v276_v15, %v275_v14  ;;  %656 = vmatprep.subr.bf16.mxu0 (!%p170_p3), %v655_v12  ;;  %v659_v21 = vpack.c.bf16 (!%p170_p3), %v262_v19, %v261_v18  ;;  %v246_v22 = vld [vmem:[%s986_s1 + $0x28] sm:$0xff] (!%p170_p3)  ;;  %v277_v23 = vld [vmem:[%s986_s1 + $0x120] sm:$0xff] (!%p170_p3)  ;;  %v263_v26 = vld [vmem:[%s986_s1 + $0xb0] sm:$0xff] (!%p170_p3) }
   0xc   : > { %686 = vmatpush3.bf16.msra.mxu1 (!%p170_p3), %v683_v8  ;;  %v278_v24 = vld [vmem:[%s986_s1 + $0x128] sm:$0xff] (!%p170_p3)  ;;  %v264_v27 = vld [vmem:[%s986_s1 + $0xb8] sm:$0xff] (!%p170_p3)  ;;  %v279_v28 = vld [vmem:[%s986_s1 + $0x130] sm:$0xff] (!%p170_p3)  ;;  %v661_v30 = vpack.c.bf16 (!%p170_p3), %v246_v22, %v245_v20 }
   0xd   : > { %688 = vmatprep.subr.bf16.mxu1 (!%p170_p3), %v687_v17  ;;  %v691_v25 = vpack.c.bf16 (!%p170_p3), %v278_v24, %v277_v23  ;;  %v280_v29 = vld [vmem:[%s986_s1 + $0x138] sm:$0xff] (!%p170_p3)  ;;  %v663_v31 = vpack.c.bf16 (!%p170_p3), %v264_v27, %v263_v26  ;;  %v247_v32 = vld [vmem:[%s986_s1 + $0x30] sm:$0xff] (!%p170_p3)  ;;  %v265_v35 = vld [vmem:[%s986_s1 + $0xc0] sm:$0xff] (!%p170_p3) }
   0xe   : > { %s995_s22 = smov (!%p823_p4, %s553_s22), 3  ;;  %658 = vmatpush3.bf16.msra.mxu0 %v657_v16  ;;  %v248_v33 = vld [vmem:[%s986_s1 + $0x38] sm:$0xff]  ;;  %v695_v34 = vpack.c.bf16 %v280_v29, %v279_v28  ;;  %v266_v36 = vld [vmem:[%s986_s1 + $0xc8] sm:$0xff]  ;;  %v281_v37 = vld [vmem:[%s986_s1 + $0x140] sm:$0xff] }
   0xf   : > { %660 = vmatprep.subr.bf16.mxu0 %v659_v21  ;;  %s715_s19 = smul.u32 24, %s995_s22  ;;  %v282_v38 = vld [vmem:[%s986_s1 + $0x148] sm:$0xff]  ;;  %v665_v39 = vpack.c.bf16 %v248_v33, %v247_v32  ;;  %v667_v40 = vpack.c.bf16 %v266_v36, %v265_v35  ;;  %v249_v41 = vld [vmem:[%s986_s1 + $0x40] sm:$0xff]  ;;  %v267_v44 = vld [vmem:[%s986_s1 + $0xd0] sm:$0xff]  ;;  %s556_s30 = sshll.u32 %s995_s22, 3 }
  0x10   : > { %690 = vmatpush3.bf16.msra.mxu1 %v687_v17  ;;  %v250_v42 = vld [vmem:[%s986_s1 + $0x48] sm:$0xff]  ;;  %v699_v43 = vpack.c.bf16 %v282_v38, %v281_v37  ;;  %v268_v45 = vld [vmem:[%s986_s1 + $0xd8] sm:$0xff]  ;;  %v283_v46 = vld [vmem:[%s986_s1 + $0x150] sm:$0xff] }
  0x11   : > { %692 = vmatprep.subr.bf16.mxu1 %v691_v25  ;;  %s907_s9 = scalar_lea.vmem %s985_s0, %s715_s19  ;;  %v284_v47 = vld [vmem:[%s986_s1 + $0x158] sm:$0xff]  ;;  %v669_v48 = vpack.c.bf16 %v250_v42, %v249_v41  ;;  %v671_v51 = vpack.c.bf16 %v268_v45, %v267_v44  ;;  %v251_v52 = vld [vmem:[%s986_s1 + $0x50] sm:$0xff]  ;;  %v269_v55 = vld [vmem:[%s986_s1 + $0xe0] sm:$0xff] }
  0x12   : > { %662 = vmatpush3.bf16.msra.mxu0 %v661_v30  ;;  %v236_v49 = vld [vmem:[%s907_s9 + $0x8] sm:$0xff]  ;;  %v237_v50 = vld [vmem:[%s907_s9 + $0x10] sm:$0xff]  ;;  %v252_v53 = vld [vmem:[%s986_s1 + $0x58] sm:$0xff]  ;;  %v703_v54 = vpack.c.bf16 %v284_v47, %v283_v46 }
  0x13   : > { %664 = vmatprep.subr.bf16.mxu0 %v663_v31  ;;  %v270_v56 = vld [vmem:[%s986_s1 + $0xe8] sm:$0xff]  ;;  %353 = vmatprep.mubr.f32.mxu0 %v236_v49  ;;  %v285_v57 = vld [vmem:[%s986_s1 + $0x160] sm:$0xff]  ;;  %v673_v59 = vpack.c.bf16 %v252_v53, %v251_v52  ;;  %v271_v0 = vld [vmem:[%s986_s1 + $0xf0] sm:$0xff] }
  0x14   : > { %694 = vmatpush3.bf16.msra.mxu1 %v691_v25  ;;  %v286_v58 = vld [vmem:[%s986_s1 + $0x168] sm:$0xff]  ;;  %648 = vmatprep.mubr.f32.mxu1 %v237_v50  ;;  %v675_v60 = vpack.c.bf16 %v270_v56, %v269_v55  ;;  %v253_v61 = vld [vmem:[%s986_s1 + $0x60] sm:$0xff]  ;;  %v272_v1 = vld [vmem:[%s986_s1 + $0xf8] sm:$0xff] }
  0x15   : > { %696 = vmatprep.subr.bf16.mxu1 %v695_v34  ;;  %v254_v62 = vld [vmem:[%s986_s1 + $0x68] sm:$0xff]  ;;  %v707_v63 = vpack.c.bf16 %v286_v58, %v285_v57  ;;  %v287_v2 = vld [vmem:[%s986_s1 + $0x170] sm:$0xff]  ;;  %v288_v3 = vld [vmem:[%s986_s1 + $0x178] sm:$0xff]  ;;  %v679_v5 = vpack.c.bf16 %v272_v1, %v271_v0 }
  0x16   : > { %666 = vmatpush3.bf16.msra.mxu0 %v665_v39  ;;  %v677_v4 = vpack.c.bf16 %v254_v62, %v253_v61  ;;  %v255_v6 = vld [vmem:[%s986_s1 + $0x70] sm:$0xff]  ;;  %v256_v7 = vld [vmem:[%s986_s1 + $0x78] sm:$0xff]  ;;  %v711_v8 = vpack.c.bf16 %v288_v3, %v287_v2  ;;  %v235_v10 = vld [vmem:[%s907_s9] sm:$0xff] }
  0x17   : > { %668 = vmatprep.subr.bf16.mxu0 %v667_v40  ;;  %v681_v9 = vpack.c.bf16 %v256_v7, %v255_v6  ;;  %v240_v11 = vld [vmem:[%s907_s9 + $0x28] sm:$0xff]  ;;  %v239_v12 = vld [vmem:[%s907_s9 + $0x20] sm:$0xff]  ;;  %v238_v13 = vld [vmem:[%s907_s9 + $0x18] sm:$0xff]  ;;  %s225_s9 = scalar_lea.vmem %s988_s3, %s556_s30 }
  0x18   : > { %698 = vmatpush3.bf16.msra.mxu1 %v695_v34  ;;  %v557_v19 = vld [vmem:[%s987_s2] ss:$0 sm:$0xff] }
  0x19   : > { %700 = vmatprep.subr.bf16.mxu1 %v699_v43 }
  0x1a   : > { %670 = vmatpush3.bf16.msra.mxu0 %v669_v48 }
  0x1b   : > { %672 = vmatprep.subr.bf16.mxu0 %v671_v51 }
  0x1c   : > { %702 = vmatpush3.bf16.msra.mxu1 %v699_v43 }
  0x1d   : > { %704 = vmatprep.subr.bf16.mxu1 %v703_v54 }
  0x1e   : > { %674 = vmatpush3.bf16.msra.mxu0 %v673_v59 }
  0x1f   : > { %676 = vmatprep.subr.bf16.mxu0 %v675_v60 }
  0x20   : > { %706 = vmatpush3.bf16.msra.mxu1 %v703_v54 }
  0x21   : > { %708 = vmatprep.subr.bf16.mxu1 %v707_v63 }
  0x22   : > { %678 = vmatpush3.bf16.msra.mxu0 %v677_v4 }
  0x23   : > { %680 = vmatprep.subr.bf16.mxu0 %v679_v5 }
  0x24   : > { %710 = vmatpush3.bf16.msra.mxu1 %v707_v63 }
  0x25   : > { %712 = vmatprep.subr.bf16.mxu1 %v711_v8 }
  0x26   : > { %682 = vmatpush3.bf16.msra.mxu0 %v681_v9 }
  0x28   : > { %714 = vmatpush3.bf16.msra.mxu1 %v711_v8 }
  0x29   : > { %354 = vmatmul.mubr.f32.vlgmr.msra.gmra.mrb[0].mxu0 %v235_v10 }
  0x2a   : > { %358 = vmatprep.mubr.f32.mxu0 %v239_v12 }
  0x2b   : > { %649 = vmatmul.mubr.f32.vlgmr.msra.gmra.mrb[0].mxu1 %v240_v11 }
  0x2d   : > { %359 = vmatmul.mubr.f32.gmra.mrb[2].mxu0 %v238_v13 }
  0xfc   : > { %v592_v14 = vpop.f32.mrb[0].mxu0 }
  0xfd   : > { %v593_v15 = vpop.f32.mrb[1].mxu0 }
  0xfe   : > { %v650_v16 = vpop.f32.mrb[0].mxu1  ;;  %v594_v17 = vadd.f32 %v593_v15, %v592_v14 }
  0xff   : > { %v430_v18 = vpop.f32.mrb[1].mxu1 }
 0x100   : > { %v431_v20 = vadd.f32 %v594_v17, %v430_v18  ;;  %v595_v21 = vpop.f32.mrb[2].mxu0 }
 0x101   : > { %v596_v22 = vpop.f32.mrb[3].mxu0 }
 0x102   : > { %v455_v23 = vadd.f32 %v557_v19, %v431_v20  ;;  %v597_v24 = vadd.f32 %v596_v22, %v595_v21 }
 0x104   : > { %v457_v25 = vmax.f32 %v455_v23, 0.0  ;;  %v436_v26 = vadd.f32 %v650_v16, %v597_v24 }
 0x106   : > { %459 = vst [vmem:[%s225_s9] sm:$0xff] %v457_v25  ;;  %v456_v27 = vadd.f32 %v557_v19, %v436_v26 }
 0x108   : > { %v458_v28 = vmax.f32 %v456_v27, 0.0 }
 0x10a   : > { %460 = vst [vmem:[%s225_s9 + $0x8] sm:$0xff] %v458_v28 }
 0x10b PF: > { %s13_s14 = sadd.s32 1, %s762_s14   ;;  %s990_s12 = smov %s758_s13 }
 0x10c   : > { %p10_p5 = scmp.ge.s32.totalorder %s13_s14, 4   ;;  %s991_s13 = smov %s993_s15 }
 0x10e   :  { %12 = sbr.rel (!%p10_p5) target bundleno = 2 (0x2), region = 73 }

// kernel: residual_block2_forward.3
= control target key start
LH: loop header
LB: loop body
LE: loop exit
PB: predicated region body
PF: predicated region fallthrough
CT: control target
= control target key end

     0   :  { %8 = vsyncpa [#allocation4], 0  ;;  %s866_s0 = inlined_call_operand.vmem [shape: f32[32,128], index: 0, kind: input, shape index: {}]   ;;  %s867_s1 = inlined_call_operand.vmem [shape: f32[128,128], index: 1, kind: input, shape index: {}]   ;;  %s868_s2 = inlined_call_operand.vmem [shape: f32[1,128], index: 2, kind: input, shape index: {}]   ;;  %s869_s3 = inlined_call_operand.hbm [shape: f32[32,128], index: 3, kind: output, shape index: {}]  }
   0x1   :  { %10 = vsyncpa [#allocation4 + $0x1], 0  ;;  %s701_s12 = smov 0   ;;  %s703_s13 = smov 0  }
   0x2   :  { %s705_s14 = smov 0   ;;  %s707_s15 = smov 0  }
   0x3   :  { %s709_s16 = smov 0   ;;  %s711_s17 = smov 0  }
   0x4 LB: > { %s440_s18 = sadd.s32 4294967295, %s676_s17   ;;  %s441_s19 = sadd.s32 4294967294, %s676_s17   ;;  %s676_s17 = sphi %s711_s17, %s16_s17   ;;  %s672_s16 = sphi %s709_s16, %s876_s16   ;;  %s668_s15 = sphi %s707_s15, %s875_s15   ;;  %s664_s14 = sphi %s705_s14, %s874_s14   ;;  %s660_s13 = sphi %s703_s13, %s873_s13   ;;  %s656_s12 = sphi %s701_s12, %s872_s12  }
   0x5   : > { %s28_s20 = sadd.s32 1, %s672_s16  ;;  %s110_s21 = sadd.s32 1, %s664_s14 }
   0x6   : > { %p30_p0 = scmp.ge.s32.totalorder %s28_s20, 2  ;;  %p120_p1 = scmp.ne.s32.totalorder %s664_s14, %s660_s13 }
   0x7   : > { %p121_p2 = scmp.eq.s32.totalorder %s440_s18, 1  ;;  %p126_p3 = scmp.ne.s32.totalorder %s660_s13, %s656_s12 }
   0x8   : > { %s878_s20 = smov (%p30_p0, %s28_s20), 0  ;;  %p127_p5 = scmp.eq.s32.totalorder %s441_s19, 1 }
   0x9   : > { %p741_p4 = por %p121_p2, %p120_p1  ;;  %s107_s23 = ssub.s32 %s672_s16, %s878_s20 }
   0xa   : > { %p445_p6 = scmp.ge.s32.totalorder %s676_s17, 1  ;;  %p108_p7 = scmp.eq.s32.totalorder %s107_s23, 0 }
   0xb   : > { %p748_p8 = por %p127_p5, %p126_p3  ;;  %p169_p9 = scmp.lt.s32.totalorder %s676_s17, 3 }
   0xc   : > { %s754_s25 = scalar_select %p108_p7, %s664_s14, %s110_s21  }
   0xd   : > { %p170_p10 = pnand %p445_p6, %p169_p9 }
   0xe   : > { %v227_v0 = vld [vmem:[%s867_s1] sm:$0xff] (!%p170_p10)  ;;  %v228_v1 = vld [vmem:[%s867_s1 + $0x8] sm:$0xff] (!%p170_p10)  ;;  %v229_v2 = vld [vmem:[%s867_s1 + $0x10] sm:$0xff] (!%p170_p10)  ;;  %s447_s5 = sshll.u32 (!%p170_p10), %s668_s15, 1  ;;  %s198_s30 = sand.u32 (!%p170_p10), 1, %s660_s13  }
   0xf   : > { %173 = sbr.rel (%p170_p10) target bundleno = 279 (0x117), region = 32  ;;  %v509_v3 = vpack.c.bf16 (!%p170_p10), %v228_v1, %v227_v0  ;;  %v230_v4 = vld [vmem:[%s867_s1 + $0x18] sm:$0xff] (!%p170_p10)  ;;  %p202_p11 = scmp.lt.s32.totalorder (!%p170_p10), %s447_s5, 3  ;;  %v231_v6 = vld [vmem:[%s867_s1 + $0x20] sm:$0xff] (!%p170_p10)  ;;  %v232_v7 = vld [vmem:[%s867_s1 + $0x28] sm:$0xff] (!%p170_p10) }
  0x10   : > { %v513_v5 = vpack.c.bf16 (!%p170_p10), %v230_v4, %v229_v2  ;;  %v517_v8 = vpack.c.bf16 (!%p170_p10), %v232_v7, %v231_v6  ;;  %v233_v9 = vld [vmem:[%s867_s1 + $0x30] sm:$0xff] (!%p170_p10)  ;;  %v234_v10 = vld [vmem:[%s867_s1 + $0x38] sm:$0xff] (!%p170_p10)  ;;  %v235_v13 = vld [vmem:[%s867_s1 + $0x40] sm:$0xff] (!%p170_p10)  ;;  %s446_s4 = sshll.u32 (!%p170_p10), %s198_s30, 4  ;;  %s455_s9 = sshll.u32 (!%p170_p10), %s668_s15, 8 }
  0x11   : > { %510 = vmatprep.subr.bf16.mxu0 (!%p170_p10), %v509_v3  ;;  %v521_v12 = vpack.c.bf16 (!%p170_p10), %v234_v10, %v233_v9  ;;  %v236_v14 = vld [vmem:[%s867_s1 + $0x48] sm:$0xff] (!%p170_p10)  ;;  %v237_v16 = vld [vmem:[%s867_s1 + $0x50] sm:$0xff] (!%p170_p10)  ;;  %v238_v17 = vld [vmem:[%s867_s1 + $0x58] sm:$0xff] (!%p170_p10)  ;;  %s200_s7 = scalar_lea.vmem (!%p170_p10), [#allocation3], %s446_s4  ;;  %s818_s11 = scalar_lea.hbm (!%p170_p10), %s869_s3, %s455_s9 }
  0x12   : > { %512 = vmatpush3.bf16.msra.mxu0 (!%p170_p10), %v509_v3  ;;  %v525_v15 = vpack.c.bf16 (!%p170_p10), %v236_v14, %v235_v13  ;;  %v529_v18 = vpack.c.bf16 (!%p170_p10), %v238_v17, %v237_v16  ;;  %v239_v19 = vld [vmem:[%s867_s1 + $0x60] sm:$0xff] (!%p170_p10)  ;;  %v240_v20 = vld [vmem:[%s867_s1 + $0x68] sm:$0xff] (!%p170_p10)  ;;  %v241_v22 = vld [vmem:[%s867_s1 + $0x70] sm:$0xff] (!%p170_p10)  ;;  %s352_s8 = sshll.u32 (!%p170_p10), %s200_s7, 4  ;;  %s678_s15 = smov (!%p170_p10), [#allocation3]   ;;  %s813_s8 = int_to_ptr.vmem [resolvable:$true] %s352_s8 }
  0x13   : > { %514 = vmatprep.subr.bf16.mxu0 (!%p170_p10), %v513_v5  ;;  %v533_v21 = vpack.c.bf16 (!%p170_p10), %v240_v20, %v239_v19  ;;  %v242_v23 = vld [vmem:[%s867_s1 + $0x78] sm:$0xff] (!%p170_p10)  ;;  %v449_v26 = vld [vmem:[%s868_s2] ss:$0 sm:$0xff] (!%p170_p10)  ;;  %s598_s19 = scalar_lea.vmem (!%p170_p10), %s813_s8, 256  ;;  %s602_s21 = sshll.u32 (!%p170_p10), %s678_s15, 4  ;;  %s603_s21 = int_to_ptr.vmem [resolvable:$false] %s602_s21 }
  0x14   : > { %v537_v24 = vpack.c.bf16 (!%p170_p10), %v242_v23, %v241_v22  ;;  %p599_p12 = scmp.ne.s32.totalorder (!%p170_p10), %s813_s8, %s598_s19  ;;  %s604_s23 = scalar_lea.vmem (!%p170_p10), %s603_s21, 512 }
  0x15   : > { %p605_p1 = scmp.lt.s32.totalorder (!%p170_p10), %s813_s8, %s603_s21  ;;  %p606_p2 = scmp.lt.s32.totalorder (!%p170_p10), %s604_s23, %s598_s19 }
  0x16   : > { %s880_s5 = smov (!%p202_p11, %s447_s5), 3  ;;  %516 = vmatpush3.bf16.msra.mxu0 %v513_v5  ;;  %p600_p13 = pnand %p599_p12, %p741_p4 }
  0x17   : > { %s448_s18 = sshll.u32 %s880_s5, 3  ;;  %518 = vmatprep.subr.bf16.mxu0 %v517_v8  ;;  %p607_p3 = por %p606_p2, %p605_p1 }
  0x18   : > { %s208_s29 = scalar_lea.vmem %s866_s0, %s448_s18  ;;  %s820_s18 = scalar_lea.sflag [#allocation4], %s198_s30 }
  0x19   : > { %v225_v11 = vld [vmem:[%s208_s29] sm:$0xff]  ;;  %v226_v25 = vld [vmem:[%s208_s29 + $0x8] sm:$0xff]  ;;  %p601_p0 = pneg %p600_p13 }
  0x1a   : > { %506 = vmatprep.mubr.f32.mxu0 %v225_v11  ;;  %520 = vmatpush3.bf16.msra.mxu0 %v517_v8 }
  0x1b   : > { %522 = vmatprep.subr.bf16.mxu0 %v521_v12  ;;  %p608_p5 = pnand %p607_p3, %p601_p0 }
  0x1e   : > { %524 = vmatpush3.bf16.msra.mxu0 %v521_v12 }
  0x1f   : > { %526 = vmatprep.subr.bf16.mxu0 %v525_v15 }
  0x22   : > { %528 = vmatpush3.bf16.msra.mxu0 %v525_v15 }
  0x23   : > { %530 = vmatprep.subr.bf16.mxu0 %v529_v18 }
  0x26   : > { %532 = vmatpush3.bf16.msra.mxu0 %v529_v18 }
  0x27   : > { %534 = vmatprep.subr.bf16.mxu0 %v533_v21 }
  0x2a   : > { %536 = vmatpush3.bf16.msra.mxu0 %v533_v21 }
  0x2b   : > { %538 = vmatprep.subr.bf16.mxu0 %v537_v24 }
  0x2e   : > { %540 = vmatpush3.bf16.msra.mxu0 %v537_v24 }
  0x31   : > { %507 = vmatmul.mubr.f32.vlgmr.msra.gmra.mrb[0].mxu0 %v226_v25 }
 0x104   : > { %v508_v27 = vpop.f32.mrb[0].mxu0 }
 0x105   : > { %v335_v28 = vadd.f32 %v508_v27, %v449_v26  ;;  %v309_v29 = vpop.f32.mrb[1].mxu0 }
 0x106   : > { %v334_v30 = vadd.f32 %v449_v26, %v309_v29 }
 0x107   : > { %337 = vst [vmem:[%s200_s7 + $0x8] sm:$0xff] %v335_v28 }
 0x108   : > { %336 = vst [vmem:[%s200_s7] sm:$0xff] %v334_v30 }
 0x109   : > { %611 = shalt.err (!%p608_p5)
}
 0x10a   : > { %s612_s26 = scalar_lea.hbm %s818_s11, 256  ;;  %s616_s30 = scalar_lea.hbm %s869_s3, 512 }
 0x10b   : > { %p613_p6 = scmp.ne.s32.totalorder %s818_s11, %s612_s26  ;;  %p617_p10 = scmp.lt.u32.totalorder %s818_s11, %s869_s3 }
 0x10c   : > { %p618_p11 = scmp.lt.u32.totalorder %s616_s30, %s612_s26  ;;  %p620_p13 = scmp.lt.u32.totalorder %s612_s26, %s818_s11 }
 0x10d   : > { %p614_p7 = pnand %p613_p6, %p741_p4 }
 0x10e   : > { %p619_p12 = por %p618_p11, %p617_p10 }
 0x10f   : > { %p615_p9 = pneg %p614_p7 }
 0x110   : > { %p621_p0 = por %p620_p13, %p619_p12 }
 0x112   : > { %p622_p1 = pnand %p621_p0, %p615_p9 }
 0x114   : > { %625 = shalt.err (!%p622_p1)
}
 0x115   : > { %s679_s6 = smov 128   ;;  %s680_s7 = smov 8  }
 0x116   : > { %541 = dma.vmem_to_hbm [thread:$0]  (%p741_p4), %s813_s8, 256, %s818_s11, %s820_s18, %s679_s6, %s679_s6, %s680_s7  }
 0x117 PF: > { %p547_p2 = scmp.ge.s32.totalorder %s676_s17, 2  ;;  %s367_s9 = sand.u32 1, %s656_s12  }
 0x118   : > { %s368_s29 = scalar_lea.sflag [#allocation4], %s367_s9 }
 0x119   : > { %p544_p3 = pnand %p547_p2, %p748_p8 }
 0x11b   : > { %651 = dma.done.wait (!%p544_p3), %s368_s29, 256  }
 0x11c   : > { %653 = vsyncadd (!%p544_p3), %s368_s29, 4294967040  ;;  %s16_s17 = sadd.s32 1, %s676_s17   ;;  %s872_s12 = smov %s660_s13 }
 0x11d   : > { %p13_p5 = scmp.ge.s32.totalorder %s16_s17, 4   ;;  %s873_s13 = smov %s664_s14 }
 0x11e   : > { %s874_s14 = smov %s754_s25  ;;  %s875_s15 = smov %s672_s16 }
 0x11f   : > { %s876_s16 = smov %s878_s20  ;;  %15 = sbr.rel (!%p13_p5) target bundleno = 4 (0x4), region = 78 }
 0x126   :  { %373 = vsyncpa [#allocation4], 1 }
 0x127   :  { %375 = vsyncpa [#allocation4 + $0x1], 1 }

</bundles_post_ra>
